<compile_context>
chip_gen: v7x
topology: tpu7x:2x2x1
jax: 0.10.0
libtpu: 0.0.40
codegen_flags: <defaults>
</compile_context>

<pallas_src>
import functools
import math

import jax
import jax.numpy as jnp
from jax import lax
from jax.experimental import pallas as pl
from jax.experimental.pallas import tpu as pltpu

_EPS = 1e-12                 # torch.nn.functional.normalize eps
_DEFAULT_TILE_L = 16 * 1024  # 3 MiB/block (true, no padding); v5e-safe.


def _pluecker_kernel(rays_ref, out_ref, *, origin, voxel_size, inv_voxel,
                     direction_multiplier, moment_multiplier, use_local_param):
    """rays_ref / out_ref: (6, S, TL) VMEM blocks; channel c -> dense (S, TL)."""
    f32 = jnp.float32
    ox = rays_ref[0].astype(f32) - origin[0]
    oy = rays_ref[1].astype(f32) - origin[1]
    oz = rays_ref[2].astype(f32) - origin[2]
    dx = rays_ref[3].astype(f32)
    dy = rays_ref[4].astype(f32)
    dz = rays_ref[5].astype(f32)

    # L2 normalize: v / max(||v||, eps) == v * rsqrt(max(||v||^2, eps^2)) (EUP).
    ss = dx * dx + dy * dy + dz * dz
    inv = lax.rsqrt(jnp.maximum(ss, _EPS * _EPS))
    dx = dx * inv
    dy = dy * inv
    dz = dz * inv

    if use_local_param:
        # Divide replaced by trace-time reciprocal multiply. NOTE: can differ
        # from an exact divide for values landing exactly on a .5*voxel
        # boundary; use a true divide if bit-compat with torch is required.
        ox = ox - jnp.round(ox * inv_voxel[0]) * voxel_size[0]
        oy = oy - jnp.round(oy * inv_voxel[1]) * voxel_size[1]
        oz = oz - jnp.round(oz * inv_voxel[2]) * voxel_size[2]

    # moment m = rays_o x rays_d
    mx = oy * dz - oz * dy
    my = oz * dx - ox * dz
    mz = ox * dy - oy * dx

    if direction_multiplier != 1.0:
        dx = dx * direction_multiplier
        dy = dy * direction_multiplier
        dz = dz * direction_multiplier
    if moment_multiplier != 1.0:
        mx = mx * moment_multiplier
        my = my * moment_multiplier
        mz = mz * moment_multiplier

    od = out_ref.dtype
    out_ref[0] = dx.astype(od)
    out_ref[1] = dy.astype(od)
    out_ref[2] = dz.astype(od)
    out_ref[3] = mx.astype(od)
    out_ref[4] = my.astype(od)
    out_ref[5] = mz.astype(od)


def pluecker_param_channel_first(rays_cf,
                                 origin=(0.0, 0.0, 0.0),
                                 voxel_size=(1.0, 1.0, 1.0),
                                 direction_multiplier=1.0,
                                 moment_multiplier=1.0,
                                 use_local_param=False,
                                 tile_l=_DEFAULT_TILE_L):
    """Zero-layout-copy fast path: rays_cf is (6, N), f32 or bf16 -> (6, N).

    Math is always f32 inside the kernel; I/O dtype is preserved.
    """
    assert rays_cf.shape[0] == 6
    n = rays_cf.shape[1]
    if rays_cf.dtype == jnp.bfloat16:
        sub = 16                                   # bf16 sublane packing
    else:
        rays_cf = rays_cf.astype(jnp.float32)
        sub = 8                                    # f32 sublane packing
    if n == 0:
        return jnp.zeros((6, 0), rays_cf.dtype)

    # The free (6, N) -> (6, sub, N//sub) reshape needs N % sub == 0; pad the
    # (rare) ragged remainder with zeros (finite output, sliced off below).
    n_pad = ((n + sub - 1) // sub) * sub
    if n_pad != n:
        rays_cf = jnp.pad(rays_cf, ((0, 0), (0, n_pad - n)))
    l = n_pad // sub
    slab = rays_cf.reshape(6, sub, l)              # row-major: no data movement

    # tl is a multiple of 128, or equal to the full lane extent when l < tile_l.
    tl = tile_l if l >= tile_l else l
    grid = pl.cdiv(l, tl)                          # ragged tail block is masked

    voxel = tuple(float(v) for v in voxel_size)
    kernel = functools.partial(
        _pluecker_kernel,
        origin=tuple(float(v) for v in origin),
        voxel_size=voxel,
        inv_voxel=(tuple(1.0 / v for v in voxel) if use_local_param
                   else (1.0, 1.0, 1.0)),
        direction_multiplier=float(direction_multiplier),
        moment_multiplier=float(moment_multiplier),
        use_local_param=bool(use_local_param),
    )

    out = pl.pallas_call(
        kernel,
        out_shape=jax.ShapeDtypeStruct((6, sub, l), slab.dtype),
        grid_spec=pltpu.PrefetchScalarGridSpec(
            num_scalar_prefetch=0,
            grid=(grid,),
            in_specs=[pl.BlockSpec((6, sub, tl), lambda i: (0, 0, i))],
            out_specs=pl.BlockSpec((6, sub, tl), lambda i: (0, 0, i)),
        ),
        # Lane-block axis is independent -> parallel, so multi-TC parts can
        # shard the grid.
        # TODO(synk): on v7x verify the 1-D "parallel" grid actually splits
        # across both TensorCores; if not, switch to pltpu.CORE_PARALLEL or an
        # explicit leading core axis.
        compiler_params=pltpu.CompilerParams(
            dimension_semantics=(pltpu.PARALLEL,)),
    )(slab)

    out = out.reshape(6, n_pad)
    if n_pad != n:
        out = out[:, :n]
    return out


@functools.partial(jax.jit, static_argnums=(1, 2, 3, 4, 5, 6))
def _pluecker_param_impl(rays, origin, voxel_size, direction_multiplier,
                         moment_multiplier, use_local_param, tile_l):
    lead_shape = rays.shape[:-1]
    n = math.prod(lead_shape)
    io_dtype = jnp.bfloat16 if rays.dtype == jnp.bfloat16 else jnp.float32
    flat = rays.reshape(n, 6).astype(io_dtype)     # reshape: no data movement
    # NOTE: flat.T and out_slab.T are each a full HBM read+write pass while the
    # kernel itself moves only ~48 B/ray. Callers that can keep rays
    # channel-first should call pluecker_param_channel_first directly.
    slab = flat.T
    out_slab = pluecker_param_channel_first(
        slab, origin, voxel_size, direction_multiplier, moment_multiplier,
        use_local_param, tile_l)
    out = out_slab.T.reshape(*lead_shape, 6)
    return out.astype(rays.dtype)


def pluecker_param(rays,
                   origin=(0.0, 0.0, 0.0),
                   voxel_size=(1.0, 1.0, 1.0),
                   direction_multiplier=1.0,
                   moment_multiplier=1.0,
                   use_local_param=False,
                   tile_l=_DEFAULT_TILE_L):
    """Pallas implementation of PlueckerParam.forward. rays: (..., 6)."""
    assert rays.shape[-1] == 6, "expect rays[..., 6] = [origin(3), direction(3)]"
    if math.prod(rays.shape[:-1]) == 0:
        return jnp.zeros(rays.shape[:-1] + (6,), rays.dtype)
    return _pluecker_param_impl(
        rays,
        tuple(float(v) for v in origin),
        tuple(float(v) for v in voxel_size),
        float(direction_multiplier),
        float(moment_multiplier),
        bool(use_local_param),
        int(tile_l),
    )


def _pluecker_ref(rays, origin, voxel_size, direction_multiplier,
                  moment_multiplier, use_local_param):
    """Pure-JAX reference mirroring the torch module semantics."""
    origin = jnp.asarray(origin, jnp.float32)
    voxel_size = jnp.asarray(voxel_size, jnp.float32)
    rays_o = rays[..., :3] - origin
    rays_d = rays[..., 3:6]
    norm = jnp.linalg.norm(rays_d, axis=-1, keepdims=True)
    rays_d = rays_d / jnp.maximum(norm, _EPS)
    if use_local_param:
        rays_o = rays_o - jnp.round(rays_o / voxel_size) * voxel_size
    m = jnp.cross(rays_o, rays_d)
    return jnp.concatenate(
        [rays_d * direction_multiplier, m * moment_multiplier], axis=-1)


if __name__ == "__main__":
    key = jax.random.PRNGKey(0)
    k1, k2, k3, k4 = jax.random.split(key, 4)

    # Config 1: (..., 6) wrapper, nonzero origin, defaults otherwise.
    rays1 = jax.random.normal(k1, (2, 128, 6), dtype=jnp.float32)
    cfg1 = dict(origin=(0.1, -0.2, 0.3), voxel_size=(1.0, 1.0, 1.0),
                direction_multiplier=1.0, moment_multiplier=1.0,
                use_local_param=False)
    out1 = jax.block_until_ready(pluecker_param(rays1, **cfg1))
    ref1 = _pluecker_ref(rays1, **cfg1)
    assert out1.shape == rays1.shape[:-1] + (6,)
    assert jnp.allclose(out1, ref1, atol=1e-5, rtol=1e-5), "cfg1 mismatch"

    # Config 2: local param + non-unit multipliers; 200 rays -> l=25
    # (full-extent lane block, not a multiple of 128).
    rays2 = jax.random.normal(k2, (4, 50, 6), dtype=jnp.float32)
    cfg2 = dict(origin=(0.5, 0.25, -1.0), voxel_size=(0.8, 1.2, 2.0),
                direction_multiplier=2.0, moment_multiplier=0.5,
                use_local_param=True)
    out2 = jax.block_until_ready(pluecker_param(rays2, **cfg2))
    ref2 = _pluecker_ref(rays2, **cfg2)
    assert out2.shape == rays2.shape[:-1] + (6,)
    assert jnp.allclose(out2, ref2, atol=1e-5, rtol=1e-5), "cfg2 mismatch"

    # Config 3: channel-first fast path, bf16 I/O, ragged N (300 % 16 != 0)
    # -> exercises the pad/slice path and the 16-sublane bf16 layout.
    rays3_cf = jax.random.normal(
        k3, (6, 300), dtype=jnp.float32).astype(jnp.bfloat16)
    cfg3 = dict(origin=(0.0, 0.1, -0.1), voxel_size=(1.0, 1.0, 1.0),
                direction_multiplier=1.5, moment_multiplier=1.0,
                use_local_param=False)
    out3 = jax.block_until_ready(
        pluecker_param_channel_first(rays3_cf, **cfg3))
    ref3 = _pluecker_ref(rays3_cf.astype(jnp.float32).T, **cfg3).T
    assert out3.shape == (6, 300) and out3.dtype == jnp.bfloat16
    assert jnp.allclose(out3.astype(jnp.float32), ref3,
                        atol=3e-2, rtol=3e-2), "cfg3 mismatch"

    # Config 4: multi-block grid with a masked ragged tail on the lane axis
    # (n=2400 -> l=300; tile_l=128 -> grid=3, tail block 44/128 lanes valid).
    rays4 = jax.random.normal(k4, (3, 800, 6), dtype=jnp.float32)
    out4 = jax.block_until_ready(pluecker_param(rays4, **cfg2, tile_l=128))
    ref4 = _pluecker_ref(rays4, **cfg2)
    assert jnp.allclose(out4, ref4, atol=1e-5, rtol=1e-5), "cfg4 mismatch"

    print("KERNEL_OK")
</pallas_src>

<mosaic_0001>
module attributes {stable_mosaic.version = 11 : i64} {
  func.func @_pluecker_kernel(%arg0: i32, %arg1: memref<6x8x32xf32, #tpu.memory_space<vmem>>, %arg2: memref<6x8x32xf32, #tpu.memory_space<vmem>>) attributes {dimension_semantics = [#tpu.dimension_semantics<parallel>], iteration_bounds = array<i64: 1>, scalar_prefetch = 0 : i64, scratch_operands = 0 : i64, tpu.core_type = #tpu.core_type<tc>, window_params = [{transform_indices = @transform_0, window_bounds = array<i64: 6, 8, 32>}, {transform_indices = @transform_1, window_bounds = array<i64: 6, 8, 32>}]} {
    %c0 = arith.constant 0 : index
    %c0_0 = arith.constant 0 : index
    %c0_1 = arith.constant 0 : index
    %0 = vector.load %arg1[%c0, %c0_0, %c0_1] : memref<6x8x32xf32, #tpu.memory_space<vmem>>, vector<1x8x32xf32>
    %1 = vector.shape_cast %0 : vector<1x8x32xf32> to vector<8x32xf32>
    %cst = arith.constant 1.000000e-01 : f32
    %2 = vector.broadcast %cst : f32 to vector<8x32xf32>
    %3 = arith.subf %1, %2 : vector<8x32xf32>
    %c1 = arith.constant 1 : index
    %c0_2 = arith.constant 0 : index
    %c0_3 = arith.constant 0 : index
    %4 = vector.load %arg1[%c1, %c0_2, %c0_3] : memref<6x8x32xf32, #tpu.memory_space<vmem>>, vector<1x8x32xf32>
    %5 = vector.shape_cast %4 : vector<1x8x32xf32> to vector<8x32xf32>
    %cst_4 = arith.constant -2.000000e-01 : f32
    %6 = vector.broadcast %cst_4 : f32 to vector<8x32xf32>
    %7 = arith.subf %5, %6 : vector<8x32xf32>
    %c2 = arith.constant 2 : index
    %c0_5 = arith.constant 0 : index
    %c0_6 = arith.constant 0 : index
    %8 = vector.load %arg1[%c2, %c0_5, %c0_6] : memref<6x8x32xf32, #tpu.memory_space<vmem>>, vector<1x8x32xf32>
    %9 = vector.shape_cast %8 : vector<1x8x32xf32> to vector<8x32xf32>
    %cst_7 = arith.constant 3.000000e-01 : f32
    %10 = vector.broadcast %cst_7 : f32 to vector<8x32xf32>
    %11 = arith.subf %9, %10 : vector<8x32xf32>
    %c3 = arith.constant 3 : index
    %c0_8 = arith.constant 0 : index
    %c0_9 = arith.constant 0 : index
    %12 = vector.load %arg1[%c3, %c0_8, %c0_9] : memref<6x8x32xf32, #tpu.memory_space<vmem>>, vector<1x8x32xf32>
    %13 = vector.shape_cast %12 : vector<1x8x32xf32> to vector<8x32xf32>
    %c4 = arith.constant 4 : index
    %c0_10 = arith.constant 0 : index
    %c0_11 = arith.constant 0 : index
    %14 = vector.load %arg1[%c4, %c0_10, %c0_11] : memref<6x8x32xf32, #tpu.memory_space<vmem>>, vector<1x8x32xf32>
    %15 = vector.shape_cast %14 : vector<1x8x32xf32> to vector<8x32xf32>
    %c5 = arith.constant 5 : index
    %c0_12 = arith.constant 0 : index
    %c0_13 = arith.constant 0 : index
    %16 = vector.load %arg1[%c5, %c0_12, %c0_13] : memref<6x8x32xf32, #tpu.memory_space<vmem>>, vector<1x8x32xf32>
    %17 = vector.shape_cast %16 : vector<1x8x32xf32> to vector<8x32xf32>
    %18 = arith.mulf %13, %13 : vector<8x32xf32>
    %19 = arith.mulf %15, %15 : vector<8x32xf32>
    %20 = arith.addf %18, %19 : vector<8x32xf32>
    %21 = arith.mulf %17, %17 : vector<8x32xf32>
    %22 = arith.addf %20, %21 : vector<8x32xf32>
    %cst_14 = arith.constant 1.000000e-24 : f32
    %23 = vector.broadcast %cst_14 : f32 to vector<8x32xf32>
    %24 = arith.maximumf %22, %23 : vector<8x32xf32>
    %25 = math.rsqrt %24 : vector<8x32xf32>
    %26 = arith.mulf %13, %25 : vector<8x32xf32>
    %27 = arith.mulf %15, %25 : vector<8x32xf32>
    %28 = arith.mulf %17, %25 : vector<8x32xf32>
    %29 = arith.mulf %7, %28 : vector<8x32xf32>
    %30 = arith.mulf %11, %27 : vector<8x32xf32>
    %31 = arith.subf %29, %30 : vector<8x32xf32>
    %32 = arith.mulf %11, %26 : vector<8x32xf32>
    %33 = arith.mulf %3, %28 : vector<8x32xf32>
    %34 = arith.subf %32, %33 : vector<8x32xf32>
    %35 = arith.mulf %3, %27 : vector<8x32xf32>
    %36 = arith.mulf %7, %26 : vector<8x32xf32>
    %37 = arith.subf %35, %36 : vector<8x32xf32>
    %c0_15 = arith.constant 0 : index
    %c0_16 = arith.constant 0 : index
    %c0_17 = arith.constant 0 : index
    %38 = vector.load %arg2[%c0_15, %c0_16, %c0_17] : memref<6x8x32xf32, #tpu.memory_space<vmem>>, vector<1x8x32xf32>
    %39 = vector.shape_cast %38 : vector<1x8x32xf32> to vector<8x32xf32>
    %40 = vector.shape_cast %26 : vector<8x32xf32> to vector<1x8x32xf32>
    tpu.vector_store %arg2[%c0_15, %c0_16, %c0_17], %40 {strides = array<i32>} : memref<6x8x32xf32, #tpu.memory_space<vmem>>, vector<1x8x32xf32>,
    %c1_18 = arith.constant 1 : index
    %c0_19 = arith.constant 0 : index
    %c0_20 = arith.constant 0 : index
    %41 = vector.load %arg2[%c1_18, %c0_19, %c0_20] : memref<6x8x32xf32, #tpu.memory_space<vmem>>, vector<1x8x32xf32>
    %42 = vector.shape_cast %41 : vector<1x8x32xf32> to vector<8x32xf32>
    %43 = vector.shape_cast %27 : vector<8x32xf32> to vector<1x8x32xf32>
    tpu.vector_store %arg2[%c1_18, %c0_19, %c0_20], %43 {strides = array<i32>} : memref<6x8x32xf32, #tpu.memory_space<vmem>>, vector<1x8x32xf32>,
    %c2_21 = arith.constant 2 : index
    %c0_22 = arith.constant 0 : index
    %c0_23 = arith.constant 0 : index
    %44 = vector.load %arg2[%c2_21, %c0_22, %c0_23] : memref<6x8x32xf32, #tpu.memory_space<vmem>>, vector<1x8x32xf32>
    %45 = vector.shape_cast %44 : vector<1x8x32xf32> to vector<8x32xf32>
    %46 = vector.shape_cast %28 : vector<8x32xf32> to vector<1x8x32xf32>
    tpu.vector_store %arg2[%c2_21, %c0_22, %c0_23], %46 {strides = array<i32>} : memref<6x8x32xf32, #tpu.memory_space<vmem>>, vector<1x8x32xf32>,
    %c3_24 = arith.constant 3 : index
    %c0_25 = arith.constant 0 : index
    %c0_26 = arith.constant 0 : index
    %47 = vector.load %arg2[%c3_24, %c0_25, %c0_26] : memref<6x8x32xf32, #tpu.memory_space<vmem>>, vector<1x8x32xf32>
    %48 = vector.shape_cast %47 : vector<1x8x32xf32> to vector<8x32xf32>
    %49 = vector.shape_cast %31 : vector<8x32xf32> to vector<1x8x32xf32>
    tpu.vector_store %arg2[%c3_24, %c0_25, %c0_26], %49 {strides = array<i32>} : memref<6x8x32xf32, #tpu.memory_space<vmem>>, vector<1x8x32xf32>,
    %c4_27 = arith.constant 4 : index
    %c0_28 = arith.constant 0 : index
    %c0_29 = arith.constant 0 : index
    %50 = vector.load %arg2[%c4_27, %c0_28, %c0_29] : memref<6x8x32xf32, #tpu.memory_space<vmem>>, vector<1x8x32xf32>
    %51 = vector.shape_cast %50 : vector<1x8x32xf32> to vector<8x32xf32>
    %52 = vector.shape_cast %34 : vector<8x32xf32> to vector<1x8x32xf32>
    tpu.vector_store %arg2[%c4_27, %c0_28, %c0_29], %52 {strides = array<i32>} : memref<6x8x32xf32, #tpu.memory_space<vmem>>, vector<1x8x32xf32>,
    %c5_30 = arith.constant 5 : index
    %c0_31 = arith.constant 0 : index
    %c0_32 = arith.constant 0 : index
    %53 = vector.load %arg2[%c5_30, %c0_31, %c0_32] : memref<6x8x32xf32, #tpu.memory_space<vmem>>, vector<1x8x32xf32>
    %54 = vector.shape_cast %53 : vector<1x8x32xf32> to vector<8x32xf32>
    %55 = vector.shape_cast %37 : vector<8x32xf32> to vector<1x8x32xf32>
    tpu.vector_store %arg2[%c5_30, %c0_31, %c0_32], %55 {strides = array<i32>} : memref<6x8x32xf32, #tpu.memory_space<vmem>>, vector<1x8x32xf32>,
    return
  }
  func.func @transform_0(%arg0: i32) -> (i32, i32, i32) {
    %c0_i32 = arith.constant 0 : i32
    %c0_i32_0 = arith.constant 0 : i32
    %c0_i32_1 = arith.constant 0 : i32
    return %c0_i32, %c0_i32_0, %arg0 : i32, i32, i32
  }
  func.func @transform_1(%arg0: i32) -> (i32, i32, i32) {
    %c0_i32 = arith.constant 0 : i32
    %c0_i32_0 = arith.constant 0 : i32
    %c0_i32_1 = arith.constant 0 : i32
    return %c0_i32, %c0_i32_0, %arg0 : i32, i32, i32
  }
}

</mosaic_0001>

<bundles_post_ra>
// kernel: _pluecker_param_impl.1
= control target key start
LH: loop header
LB: loop body
LE: loop exit
PB: predicated region body
PF: predicated region fallthrough
CT: control target
= control target key end

     0   :  { %vm41_vm0 = vcmask 261120   ;;  %s124_s0 = inlined_call_operand.vmem [shape: f32[6,8,32], index: 0, kind: input, shape index: {}]   ;;  %s125_s1 = inlined_call_operand.vmem [shape: f32[6,8,32], index: 1, kind: output, shape index: {}]  }
   0x1   :  { %v62_v0 = vld [vmem:[%s124_s0 + $0x18] sm:$0xff]  ;;  %v63_v1 = vld [vmem:[%s124_s0 + $0x20] sm:$0xff]  ;;  %v64_v2 = vld [vmem:[%s124_s0 + $0x28] sm:$0xff] }
   0x2   :  { %v22_v3 = vmul.f32 %v62_v0, %v62_v0  ;;  %v23_v4 = vmul.f32 %v63_v1, %v63_v1  ;;  %v25_v5 = vmul.f32 %v64_v2, %v64_v2  ;;  %v58_v9 = vld [vmem:[%s124_s0 + $0x8] sm:$0xff]  ;;  %v60_v10 = vld [vmem:[%s124_s0 + $0x10] sm:$0xff]  ;;  %v8_v11 = vld [vmem:[%s124_s0] sm:$0xff] }
   0x3   :  { %v59_v12 = vadd.f32 0.2, %v58_v9  ;;  %v61_v13 = vadd.f32 -0.3, %v60_v10  ;;  %v57_v14 = vadd.f32 -0.1, %v8_v11 }
   0x4   :  { %v24_v6 = vadd.f32 %v23_v4, %v22_v3 }
   0x6   :  { %v26_v7 = vadd.f32 %v25_v5, %v24_v6 }
   0x8   :  { %v27_v8 = vmax.f32 %v26_v7, 1e-24 }
   0xa   :  { %70 = vrsqrt.f32 %v27_v8 }
  0x14   :  { %v71_v15 = vpop.eup %70 }
  0x15   :  { %v29_v16 = vmul.f32 %v71_v15, %v62_v0  ;;  %v30_v17 = vmul.f32 %v71_v15, %v63_v1  ;;  %v31_v18 = vmul.f32 %v71_v15, %v64_v2 }
  0x17   :  { %42 = vst.msk [vmem:[%s125_s1] sm:$0xff] %vm41_vm0, %v29_v16  ;;  %65 = vst.msk [vmem:[%s125_s1 + $0x8] sm:$0xff] %vm41_vm0, %v30_v17  ;;  %v32_v19 = vmul.f32 %v59_v12, %v31_v18  ;;  %v33_v20 = vmul.f32 %v61_v13, %v30_v17  ;;  %v35_v21 = vmul.f32 %v61_v13, %v29_v16 }
  0x18   :  { %66 = vst.msk [vmem:[%s125_s1 + $0x10] sm:$0xff] %vm41_vm0, %v31_v18  ;;  %v36_v22 = vmul.f32 %v57_v14, %v31_v18  ;;  %v38_v23 = vmul.f32 %v57_v14, %v30_v17  ;;  %v39_v24 = vmul.f32 %v59_v12, %v29_v16 }
  0x19   :  { %v34_v25 = vsub.f32 %v32_v19, %v33_v20 }
  0x1a   :  { %v37_v26 = vsub.f32 %v35_v21, %v36_v22  ;;  %v40_v27 = vsub.f32 %v38_v23, %v39_v24 }
  0x1b   :  { %67 = vst.msk [vmem:[%s125_s1 + $0x18] sm:$0xff] %vm41_vm0, %v34_v25 }
  0x1c   :  { %68 = vst.msk [vmem:[%s125_s1 + $0x20] sm:$0xff] %vm41_vm0, %v37_v26  ;;  %69 = vst.msk [vmem:[%s125_s1 + $0x28] sm:$0xff] %vm41_vm0, %v40_v27 }

</bundles_post_ra>
